<compile_context>
chip_gen: v6e
topology: v6e:2x2x1
jax: 0.10.0
libtpu: 0.0.40
codegen_flags: <defaults>
</compile_context>

<pallas_src>
import functools

import jax
import jax.numpy as jnp
from jax import lax
from jax.experimental import pallas as pl
from jax.experimental.pallas import tpu as pltpu

_LANE = 128


def _round_up(n, m):
    return ((n + m - 1) // m) * m


def _vae_kernel(x_ref, eps_ref,
                w1_ref, b1_ref,
                wms_ref, bms_ref,
                w3_ref, b3_ref,
                w4_ref, b4_ref,
                out_ref, kl_ref,
                *, n_rows, tile_rows, latent_size, l_pad):
    i = pl.program_id(0)

    x = x_ref[...]                      # (T, D_pad)
    eps = eps_ref[...]                  # (T, L_pad)
    b1 = b1_ref[...]                    # biases read once (hoisted)
    bms = bms_ref[...]
    b3 = b3_ref[...]
    b4 = b4_ref[...]

    # ---- encode ----
    h1 = jnp.dot(x, w1_ref[...], preferred_element_type=jnp.float32) + b1
    h1 = jnp.maximum(h1, 0.0)                                   # relu, (T, H_pad)

    # fused mu|sigma projection: single MXU push, then slice at lane boundary.
    ms = jnp.dot(h1, wms_ref[...], preferred_element_type=jnp.float32) + bms
    mu = ms[:, :l_pad]                                          # (T, L_pad)
    sigma = ms[:, l_pad:]                                       # (T, L_pad)

    # ---- reparameterize ----
    z = mu + sigma * eps                                        # (T, L_pad)

    # ---- KL (masked: only real rows / real latent lanes contribute) ----
    row = i * tile_rows + lax.broadcasted_iota(jnp.int32, (tile_rows, l_pad), 0)
    lane = lax.broadcasted_iota(jnp.int32, (tile_rows, l_pad), 1)
    valid = (row < n_rows) & (lane < latent_size)
    sig2 = sigma * sigma
    kl_terms = sig2 + mu * mu - jnp.log(sig2) - 1.0
    kl_tile = 0.5 * jnp.sum(jnp.where(valid, kl_terms, 0.0), keepdims=True)  # (1, 1)
    kl_ref[...] = jnp.broadcast_to(kl_tile, kl_ref.shape)       # (1, 8, 128) per-tile partial

    # ---- decode ----
    h3 = jnp.dot(z, w3_ref[...], preferred_element_type=jnp.float32) + b3
    h3 = jnp.maximum(h3, 0.0)                                   # relu, (T, H_pad)
    out_ref[...] = jnp.dot(h3, w4_ref[...], preferred_element_type=jnp.float32) + b4


def _prepare_padded(x2d, eps, params, tile_rows):
    """Zero-pad rows to tile multiple and feature dims to 128 lanes; fuse fc21|fc22."""
    w1, b1, w21, b21, w22, b22, w3, b3, w4, b4 = params
    d_in, hidden = w1.shape
    latent = w21.shape[1]

    d_pad = _round_up(d_in, _LANE)
    h_pad = _round_up(hidden, _LANE)
    l_pad = _round_up(latent, _LANE)

    n_rows = x2d.shape[0]
    n_pad = _round_up(n_rows, tile_rows)

    x_p = jnp.pad(x2d.astype(jnp.float32), ((0, n_pad - n_rows), (0, d_pad - d_in)))
    eps_p = jnp.pad(eps.astype(jnp.float32), ((0, n_pad - n_rows), (0, l_pad - latent)))

    w1_p = jnp.pad(w1, ((0, d_pad - d_in), (0, h_pad - hidden)))
    b1_p = jnp.pad(b1, ((0, 0), (0, h_pad - hidden)))

    # Fused mu|sigma weight/bias: mu in lanes [0, l_pad), sigma in [l_pad, 2*l_pad).
    wms = jnp.zeros((h_pad, 2 * l_pad), jnp.float32)
    wms = wms.at[:hidden, :latent].set(w21).at[:hidden, l_pad:l_pad + latent].set(w22)
    bms = jnp.zeros((1, 2 * l_pad), jnp.float32)
    bms = bms.at[:, :latent].set(b21).at[:, l_pad:l_pad + latent].set(b22)

    w3_p = jnp.pad(w3, ((0, l_pad - latent), (0, h_pad - hidden)))
    b3_p = jnp.pad(b3, ((0, 0), (0, h_pad - hidden)))
    w4_p = jnp.pad(w4, ((0, h_pad - hidden), (0, d_pad - d_in)))
    b4_p = jnp.pad(b4, ((0, 0), (0, d_pad - d_in)))

    dims = dict(d_in=d_in, hidden=hidden, latent=latent,
                d_pad=d_pad, h_pad=h_pad, l_pad=l_pad,
                n_rows=n_rows, n_pad=n_pad)
    tensors = (x_p, eps_p, w1_p, b1_p, wms, bms, w3_p, b3_p, w4_p, b4_p)
    return tensors, dims


def flexible_vae_forward(x, eps, params, *, tile_rows=512):
    """x: (B, S, D_in) or (N, D_in) float32; eps: (N_rows, latent) float32."""
    if x.ndim == 3:
        x2d = x.reshape(-1, x.shape[-1])
    elif x.ndim == 2:
        x2d = x
    else:
        raise ValueError(f"Shape of x is {x.shape}")

    n_rows = x2d.shape[0]
    latent = params[2].shape[1]
    if eps.shape != (n_rows, latent):
        raise ValueError(f"eps shape {eps.shape} != {(n_rows, latent)}")

    # Tile: large enough to pipeline well (512 rows for f32), clamped for tiny inputs.
    tile_rows = min(tile_rows, _round_up(n_rows, 8))

    tensors, dims = _prepare_padded(x2d, eps, params, tile_rows)
    (x_p, eps_p, w1_p, b1_p, wms, bms, w3_p, b3_p, w4_p, b4_p) = tensors
    d_pad, h_pad, l_pad = dims["d_pad"], dims["h_pad"], dims["l_pad"]
    n_pad = dims["n_pad"]
    grid = n_pad // tile_rows

    kernel = functools.partial(
        _vae_kernel,
        n_rows=n_rows, tile_rows=tile_rows,
        latent_size=latent, l_pad=l_pad)

    row_spec = lambda block_cols: pl.BlockSpec((tile_rows, block_cols), lambda i: (i, 0))
    fixed_spec = lambda shape: pl.BlockSpec(shape, lambda i: (0, 0))

    in_specs = [
        row_spec(d_pad),                   # x
        row_spec(l_pad),                   # eps
        fixed_spec((d_pad, h_pad)),        # w1
        fixed_spec((1, h_pad)),            # b1
        fixed_spec((h_pad, 2 * l_pad)),    # w_ms (fused fc21|fc22)
        fixed_spec((1, 2 * l_pad)),        # b_ms
        fixed_spec((l_pad, h_pad)),        # w3
        fixed_spec((1, h_pad)),            # b3
        fixed_spec((h_pad, d_pad)),        # w4
        fixed_spec((1, d_pad)),            # b4
    ]
    out_specs = (
        pl.BlockSpec((tile_rows, d_pad), lambda i: (i, 0)),      # decoded (lane-dense)
        pl.BlockSpec((1, 8, _LANE), lambda i: (i, 0, 0)),        # per-tile KL partial
    )

    weight_bytes = sum(t.size for t in (w1_p, b1_p, wms, bms, w3_p, b3_p, w4_p, b4_p)) * 4
    cost = pl.CostEstimate(
        flops=2 * n_pad * (d_pad * h_pad + h_pad * 2 * l_pad + l_pad * h_pad + h_pad * d_pad),
        transcendentals=n_pad * l_pad,
        bytes_accessed=4 * (x_p.size + eps_p.size + n_pad * d_pad + grid * 8 * _LANE)
                       + weight_bytes,
    )

    out_p, kl_parts = pl.pallas_call(
        kernel,
        grid=(grid,),
        in_specs=in_specs,
        out_specs=out_specs,
        out_shape=(
            jax.ShapeDtypeStruct((n_pad, d_pad), jnp.float32),
            jax.ShapeDtypeStruct((grid, 8, _LANE), jnp.float32),
        ),
        compiler_params=pltpu.CompilerParams(dimension_semantics=("parallel",)),
        cost_estimate=cost,
    )(x_p, eps_p, w1_p, b1_p, wms, bms, w3_p, b3_p, w4_p, b4_p)

    decoded = out_p[:n_rows, :dims["d_in"]].reshape(x.shape)
    kl = jnp.sum(kl_parts[:, 0, 0])
    return decoded, kl


def init_params(key, input_size, latent_size, hidden_size):
    """Deterministic synthetic params.  Linear(in, out) -> W:(in,out), b:(1,out)."""
    def linear(k, fan_in, fan_out):
        kw, kb = jax.random.split(k)
        bound = 1.0 / jnp.sqrt(fan_in)
        w = jax.random.uniform(kw, (fan_in, fan_out), jnp.float32, -bound, bound)
        b = jax.random.uniform(kb, (1, fan_out), jnp.float32, -bound, bound)
        return w, b

    k1, k21, k22, k3, k4 = jax.random.split(key, 5)
    w1, b1 = linear(k1, input_size, hidden_size)      # fc1
    w21, b21 = linear(k21, hidden_size, latent_size)  # fc21 (mu)
    w22, b22 = linear(k22, hidden_size, latent_size)  # fc22 (sigma)
    w3, b3 = linear(k3, latent_size, hidden_size)     # fc3
    w4, b4 = linear(k4, hidden_size, input_size)      # fc4
    return (w1, b1, w21, b21, w22, b22, w3, b3, w4, b4)


def _reference_forward(x, eps, params):
    """Pure-JAX reference matching the PyTorch module (HIGHEST precision dots)."""
    w1, b1, w21, b21, w22, b22, w3, b3, w4, b4 = params
    hp = jax.lax.Precision.HIGHEST
    x2d = x.reshape(-1, x.shape[-1])
    h1 = jnp.maximum(jnp.dot(x2d, w1, precision=hp) + b1, 0.0)
    mu = jnp.dot(h1, w21, precision=hp) + b21
    sigma = jnp.dot(h1, w22, precision=hp) + b22
    z = mu + sigma * eps
    kl = 0.5 * jnp.sum(sigma ** 2 + mu ** 2 - jnp.log(sigma ** 2) - 1.0)
    h3 = jnp.maximum(jnp.dot(z, w3, precision=hp) + b3, 0.0)
    decoded = (jnp.dot(h3, w4, precision=hp) + b4).reshape(x.shape)
    return decoded, kl


if __name__ == "__main__":
    input_size, latent_size, hidden_size = 16, 8, 32
    batch, seq = 2, 8

    key = jax.random.PRNGKey(0)
    kx, keps, kparams = jax.random.split(key, 3)

    x = jax.random.normal(kx, (batch, seq, input_size), jnp.float32)
    eps = jax.random.normal(keps, (batch * seq, latent_size), jnp.float32)
    params = init_params(kparams, input_size, latent_size, hidden_size)

    decoded, kl = flexible_vae_forward(x, eps, params)
    jax.block_until_ready(decoded)
    jax.block_until_ready(kl)

    ref_decoded, ref_kl = _reference_forward(x, eps, params)
    assert decoded.shape == x.shape
    assert jnp.allclose(decoded, ref_decoded, atol=2e-3, rtol=2e-3), \
        float(jnp.max(jnp.abs(decoded - ref_decoded)))
    assert jnp.allclose(kl, ref_kl, atol=1e-2, rtol=1e-2), (float(kl), float(ref_kl))

    print("KERNEL_OK")
</pallas_src>

<mosaic_0001>
module attributes {stable_mosaic.version = 11 : i64} {
  func.func @_vae_kernel(%arg0: i32, %arg1: memref<16x128xf32, #tpu.memory_space<vmem>>, %arg2: memref<16x128xf32, #tpu.memory_space<vmem>>, %arg3: memref<128x128xf32, #tpu.memory_space<vmem>>, %arg4: memref<1x128xf32, #tpu.memory_space<vmem>>, %arg5: memref<128x256xf32, #tpu.memory_space<vmem>>, %arg6: memref<1x256xf32, #tpu.memory_space<vmem>>, %arg7: memref<128x128xf32, #tpu.memory_space<vmem>>, %arg8: memref<1x128xf32, #tpu.memory_space<vmem>>, %arg9: memref<128x128xf32, #tpu.memory_space<vmem>>, %arg10: memref<1x128xf32, #tpu.memory_space<vmem>>, %arg11: memref<16x128xf32, #tpu.memory_space<vmem>>, %arg12: memref<1x8x128xf32, #tpu.memory_space<vmem>>) attributes {dimension_semantics = [#tpu.dimension_semantics<parallel>], iteration_bounds = array<i64: 1>, scalar_prefetch = 0 : i64, scratch_operands = 0 : i64, tpu.core_type = #tpu.core_type<tc>, window_params = [{transform_indices = @transform_0, window_bounds = array<i64: 16, 128>}, {transform_indices = @transform_1, window_bounds = array<i64: 16, 128>}, {pipeline_mode = #tpu.pipeline_mode<synchronous>, transform_indices = @transform_2, window_bounds = array<i64: 128, 128>}, {pipeline_mode = #tpu.pipeline_mode<synchronous>, transform_indices = @transform_3, window_bounds = array<i64: 1, 128>}, {pipeline_mode = #tpu.pipeline_mode<synchronous>, transform_indices = @transform_4, window_bounds = array<i64: 128, 256>}, {pipeline_mode = #tpu.pipeline_mode<synchronous>, transform_indices = @transform_5, window_bounds = array<i64: 1, 256>}, {pipeline_mode = #tpu.pipeline_mode<synchronous>, transform_indices = @transform_6, window_bounds = array<i64: 128, 128>}, {pipeline_mode = #tpu.pipeline_mode<synchronous>, transform_indices = @transform_7, window_bounds = array<i64: 1, 128>}, {pipeline_mode = #tpu.pipeline_mode<synchronous>, transform_indices = @transform_8, window_bounds = array<i64: 128, 128>}, {pipeline_mode = #tpu.pipeline_mode<synchronous>, transform_indices = @transform_9, window_bounds = array<i64: 1, 128>}, {transform_indices = @transform_10, window_bounds = array<i64: 16, 128>}, {transform_indices = @transform_11, window_bounds = array<i64: 1, 8, 128>}]} {
    %c0 = arith.constant 0 : index
    %c0_0 = arith.constant 0 : index
    %0 = vector.load %arg1[%c0, %c0_0] : memref<16x128xf32, #tpu.memory_space<vmem>>, vector<16x128xf32>
    %c0_1 = arith.constant 0 : index
    %c0_2 = arith.constant 0 : index
    %1 = vector.load %arg2[%c0_1, %c0_2] : memref<16x128xf32, #tpu.memory_space<vmem>>, vector<16x128xf32>
    %c0_3 = arith.constant 0 : index
    %c0_4 = arith.constant 0 : index
    %2 = vector.load %arg4[%c0_3, %c0_4] : memref<1x128xf32, #tpu.memory_space<vmem>>, vector<1x128xf32>
    %c0_5 = arith.constant 0 : index
    %c0_6 = arith.constant 0 : index
    %3 = vector.load %arg6[%c0_5, %c0_6] : memref<1x256xf32, #tpu.memory_space<vmem>>, vector<1x256xf32>
    %c0_7 = arith.constant 0 : index
    %c0_8 = arith.constant 0 : index
    %4 = vector.load %arg8[%c0_7, %c0_8] : memref<1x128xf32, #tpu.memory_space<vmem>>, vector<1x128xf32>
    %c0_9 = arith.constant 0 : index
    %c0_10 = arith.constant 0 : index
    %5 = vector.load %arg10[%c0_9, %c0_10] : memref<1x128xf32, #tpu.memory_space<vmem>>, vector<1x128xf32>
    %c0_11 = arith.constant 0 : index
    %c0_12 = arith.constant 0 : index
    %6 = vector.load %arg3[%c0_11, %c0_12] : memref<128x128xf32, #tpu.memory_space<vmem>>, vector<128x128xf32>
    %cst = arith.constant dense<0.000000e+00> : vector<16x128xf32>
    %7 = tpu.matmul %0, %6, %cst {dimension_numbers = #tpu.dot_dimension_numbers<[1], [0], [0], [1], [0, 0, 1, 1], [], []>} : vector<16x128xf32>, vector<128x128xf32>, vector<16x128xf32> -> vector<16x128xf32>
    %8 = vector.broadcast %2 : vector<1x128xf32> to vector<16x128xf32>
    %9 = arith.addf %7, %8 : vector<16x128xf32>
    %cst_13 = arith.constant 0.000000e+00 : f32
    %10 = vector.broadcast %cst_13 : f32 to vector<16x128xf32>
    %11 = arith.maximumf %9, %10 : vector<16x128xf32>
    %c0_14 = arith.constant 0 : index
    %c0_15 = arith.constant 0 : index
    %12 = vector.load %arg5[%c0_14, %c0_15] : memref<128x256xf32, #tpu.memory_space<vmem>>, vector<128x256xf32>
    %cst_16 = arith.constant dense<0.000000e+00> : vector<16x256xf32>
    %13 = tpu.matmul %11, %12, %cst_16 {dimension_numbers = #tpu.dot_dimension_numbers<[1], [0], [0], [1], [0, 0, 1, 1], [], []>} : vector<16x128xf32>, vector<128x256xf32>, vector<16x256xf32> -> vector<16x256xf32>
    %14 = vector.broadcast %3 : vector<1x256xf32> to vector<16x256xf32>
    %15 = arith.addf %13, %14 : vector<16x256xf32>
    %16 = vector.extract_strided_slice %15 {offsets = [0, 0], sizes = [16, 128], strides = [1, 1]} : vector<16x256xf32> to vector<16x128xf32>
    %17 = vector.extract_strided_slice %15 {offsets = [0, 128], sizes = [16, 128], strides = [1, 1]} : vector<16x256xf32> to vector<16x128xf32>
    %18 = arith.mulf %17, %1 : vector<16x128xf32>
    %19 = arith.addf %16, %18 : vector<16x128xf32>
    %c16_i32 = arith.constant 16 : i32
    %20 = arith.muli %arg0, %c16_i32 : i32
    %21 = tpu.iota {dimensions = array<i32: 0>} : vector<16x128xi32>
    %22 = vector.broadcast %20 : i32 to vector<16x128xi32>
    %23 = arith.addi %22, %21 : vector<16x128xi32>
    %24 = tpu.iota {dimensions = array<i32: 1>} : vector<16x128xi32>
    %c16_i32_17 = arith.constant 16 : i32
    %25 = vector.broadcast %c16_i32_17 : i32 to vector<16x128xi32>
    %26 = arith.cmpi slt, %23, %25 : vector<16x128xi32>
    %c8_i32 = arith.constant 8 : i32
    %27 = vector.broadcast %c8_i32 : i32 to vector<16x128xi32>
    %28 = arith.cmpi slt, %24, %27 : vector<16x128xi32>
    %29 = arith.andi %26, %28 : vector<16x128xi1>
    %30 = arith.mulf %17, %17 : vector<16x128xf32>
    %31 = arith.mulf %16, %16 : vector<16x128xf32>
    %32 = arith.addf %30, %31 : vector<16x128xf32>
    %33 = math.log %30 : vector<16x128xf32>
    %34 = arith.subf %32, %33 : vector<16x128xf32>
    %cst_18 = arith.constant 1.000000e+00 : f32
    %35 = vector.broadcast %cst_18 : f32 to vector<16x128xf32>
    %36 = arith.subf %34, %35 : vector<16x128xf32>
    %cst_19 = arith.constant 0.000000e+00 : f32
    %37 = vector.broadcast %cst_19 : f32 to vector<16x128xf32>
    %38 = arith.select %29, %36, %37 : vector<16x128xi1>, vector<16x128xf32>
    %39 = vector.shape_cast %38 : vector<16x128xf32> to vector<1x16x128xf32>
    %cst_20 = arith.constant dense<0.000000e+00> : vector<1xf32>
    %40 = vector.multi_reduction <add>, %39, %cst_20 [1, 2] : vector<1x16x128xf32> to vector<1xf32>
    %41 = vector.shape_cast %40 : vector<1xf32> to vector<1x1x1xf32>
    %42 = vector.extract %41[0, 0, 0] : f32 from vector<1x1x1xf32>
    %43 = vector.broadcast %42 : f32 to vector<1x1xf32>
    %cst_21 = arith.constant 5.000000e-01 : f32
    %44 = vector.broadcast %cst_21 : f32 to vector<1x1xf32>
    %45 = arith.mulf %44, %43 : vector<1x1xf32>
    %46 = vector.shape_cast %45 : vector<1x1xf32> to vector<1x1x1xf32>
    %47 = vector.broadcast %46 : vector<1x1x1xf32> to vector<1x8x128xf32>
    %c0_22 = arith.constant 0 : index
    %c0_23 = arith.constant 0 : index
    %c0_24 = arith.constant 0 : index
    %48 = vector.load %arg12[%c0_22, %c0_23, %c0_24] : memref<1x8x128xf32, #tpu.memory_space<vmem>>, vector<1x8x128xf32>
    tpu.vector_store %arg12[%c0_22, %c0_23, %c0_24], %47 {strides = array<i32>} : memref<1x8x128xf32, #tpu.memory_space<vmem>>, vector<1x8x128xf32>,
    %c0_25 = arith.constant 0 : index
    %c0_26 = arith.constant 0 : index
    %49 = vector.load %arg7[%c0_25, %c0_26] : memref<128x128xf32, #tpu.memory_space<vmem>>, vector<128x128xf32>
    %cst_27 = arith.constant dense<0.000000e+00> : vector<16x128xf32>
    %50 = tpu.matmul %19, %49, %cst_27 {dimension_numbers = #tpu.dot_dimension_numbers<[1], [0], [0], [1], [0, 0, 1, 1], [], []>} : vector<16x128xf32>, vector<128x128xf32>, vector<16x128xf32> -> vector<16x128xf32>
    %51 = vector.broadcast %4 : vector<1x128xf32> to vector<16x128xf32>
    %52 = arith.addf %50, %51 : vector<16x128xf32>
    %cst_28 = arith.constant 0.000000e+00 : f32
    %53 = vector.broadcast %cst_28 : f32 to vector<16x128xf32>
    %54 = arith.maximumf %52, %53 : vector<16x128xf32>
    %c0_29 = arith.constant 0 : index
    %c0_30 = arith.constant 0 : index
    %55 = vector.load %arg9[%c0_29, %c0_30] : memref<128x128xf32, #tpu.memory_space<vmem>>, vector<128x128xf32>
    %cst_31 = arith.constant dense<0.000000e+00> : vector<16x128xf32>
    %56 = tpu.matmul %54, %55, %cst_31 {dimension_numbers = #tpu.dot_dimension_numbers<[1], [0], [0], [1], [0, 0, 1, 1], [], []>} : vector<16x128xf32>, vector<128x128xf32>, vector<16x128xf32> -> vector<16x128xf32>
    %57 = vector.broadcast %5 : vector<1x128xf32> to vector<16x128xf32>
    %58 = arith.addf %56, %57 : vector<16x128xf32>
    %c0_32 = arith.constant 0 : index
    %c0_33 = arith.constant 0 : index
    %59 = vector.load %arg11[%c0_32, %c0_33] : memref<16x128xf32, #tpu.memory_space<vmem>>, vector<16x128xf32>
    tpu.vector_store %arg11[%c0_32, %c0_33], %58 {strides = array<i32>} : memref<16x128xf32, #tpu.memory_space<vmem>>, vector<16x128xf32>,
    return
  }
  func.func @transform_0(%arg0: i32) -> (i32, i32) {
    %c0_i32 = arith.constant 0 : i32
    %c0_i32_0 = arith.constant 0 : i32
    return %arg0, %c0_i32 : i32, i32
  }
  func.func @transform_1(%arg0: i32) -> (i32, i32) {
    %c0_i32 = arith.constant 0 : i32
    %c0_i32_0 = arith.constant 0 : i32
    return %arg0, %c0_i32 : i32, i32
  }
  func.func @transform_2(%arg0: i32) -> (i32, i32) {
    %c0_i32 = arith.constant 0 : i32
    %c0_i32_0 = arith.constant 0 : i32
    %c0_i32_1 = arith.constant 0 : i32
    return %c0_i32, %c0_i32_0 : i32, i32
  }
  func.func @transform_3(%arg0: i32) -> (i32, i32) {
    %c0_i32 = arith.constant 0 : i32
    %c0_i32_0 = arith.constant 0 : i32
    %c0_i32_1 = arith.constant 0 : i32
    return %c0_i32, %c0_i32_0 : i32, i32
  }
  func.func @transform_4(%arg0: i32) -> (i32, i32) {
    %c0_i32 = arith.constant 0 : i32
    %c0_i32_0 = arith.constant 0 : i32
    %c0_i32_1 = arith.constant 0 : i32
    return %c0_i32, %c0_i32_0 : i32, i32
  }
  func.func @transform_5(%arg0: i32) -> (i32, i32) {
    %c0_i32 = arith.constant 0 : i32
    %c0_i32_0 = arith.constant 0 : i32
    %c0_i32_1 = arith.constant 0 : i32
    return %c0_i32, %c0_i32_0 : i32, i32
  }
  func.func @transform_6(%arg0: i32) -> (i32, i32) {
    %c0_i32 = arith.constant 0 : i32
    %c0_i32_0 = arith.constant 0 : i32
    %c0_i32_1 = arith.constant 0 : i32
    return %c0_i32, %c0_i32_0 : i32, i32
  }
  func.func @transform_7(%arg0: i32) -> (i32, i32) {
    %c0_i32 = arith.constant 0 : i32
    %c0_i32_0 = arith.constant 0 : i32
    %c0_i32_1 = arith.constant 0 : i32
    return %c0_i32, %c0_i32_0 : i32, i32
  }
  func.func @transform_8(%arg0: i32) -> (i32, i32) {
    %c0_i32 = arith.constant 0 : i32
    %c0_i32_0 = arith.constant 0 : i32
    %c0_i32_1 = arith.constant 0 : i32
    return %c0_i32, %c0_i32_0 : i32, i32
  }
  func.func @transform_9(%arg0: i32) -> (i32, i32) {
    %c0_i32 = arith.constant 0 : i32
    %c0_i32_0 = arith.constant 0 : i32
    %c0_i32_1 = arith.constant 0 : i32
    return %c0_i32, %c0_i32_0 : i32, i32
  }
  func.func @transform_10(%arg0: i32) -> (i32, i32) {
    %c0_i32 = arith.constant 0 : i32
    %c0_i32_0 = arith.constant 0 : i32
    return %arg0, %c0_i32 : i32, i32
  }
  func.func @transform_11(%arg0: i32) -> (i32, i32, i32) {
    %c0_i32 = arith.constant 0 : i32
    %c0_i32_0 = arith.constant 0 : i32
    %c0_i32_1 = arith.constant 0 : i32
    return %arg0, %c0_i32, %c0_i32_0 : i32, i32, i32
  }
}

</mosaic_0001>

<bundles_post_ra>
// kernel: tpu_custom_call.1
= control target key start
LH: loop header
LB: loop body
LE: loop exit
PB: predicated region body
PF: predicated region fallthrough
CT: control target
= control target key end

     0   :  { %17 = vsyncpa [#allocation3], 0  ;;  %s1109_s0 = inlined_call_operand.hbm [shape: f32[16,128], index: 0, kind: input, shape index: {}]   ;;  %s1110_s1 = inlined_call_operand.hbm [shape: f32[16,128], index: 1, kind: input, shape index: {}]   ;;  %s1111_s2 = inlined_call_operand.hbm [shape: f32[128,128], index: 2, kind: input, shape index: {}]   ;;  %s1112_s3 = inlined_call_operand.vmem [shape: f32[1,128], index: 3, kind: input, shape index: {}]   ;;  %s1113_s4 = inlined_call_operand.hbm [shape: f32[128,256], index: 4, kind: input, shape index: {}]   ;;  %s1114_s5 = inlined_call_operand.vmem [shape: f32[1,256], index: 5, kind: input, shape index: {}]   ;;  %s1115_s6 = inlined_call_operand.hbm [shape: f32[128,128], index: 6, kind: input, shape index: {}]   ;;  %s1116_s7 = inlined_call_operand.vmem [shape: f32[1,128], index: 7, kind: input, shape index: {}]   ;;  %s1117_s8 = inlined_call_operand.hbm [shape: f32[128,128], index: 8, kind: input, shape index: {}]   ;;  %s1118_s9 = inlined_call_operand.vmem [shape: f32[1,128], index: 9, kind: input, shape index: {}]   ;;  %s1119_s10 = inlined_call_operand.hbm [shape: f32[16,128], index: 10, kind: output, shape index: {0}]   ;;  %s1120_s11 = inlined_call_operand.hbm [shape: f32[1,8,128], index: 11, kind: output, shape index: {1}]  }
   0x1   :  { %18 = vsyncpa [#allocation6], 0 }
   0x2   :  { %19 = vsyncpa [#allocation9], 0 }
   0x3   :  { %20 = vsyncpa [#allocation12], 0 }
   0x4   :  { %21 = vsyncpa [#allocation4], 0 }
   0x5   :  { %22 = vsyncpa [#allocation15], 0  ;;  %s982_s17 = smov [#allocation5]   ;;  %s983_s19 = smov [#allocation8]  }
   0x6   :  { %s40_s18 = sshll.u32 %s982_s17, 4  ;;  %s66_s20 = sshll.u32 %s983_s19, 4  ;;  %s41_s18 = int_to_ptr.vmem [resolvable:$true] %s40_s18  ;;  %s67_s20 = int_to_ptr.vmem [resolvable:$true] %s66_s20 }
   0x7   :  { %s818_s21 = scalar_lea.vmem %s41_s18, 256  ;;  %p823_p1 = scmp.lt.s32.totalorder %s41_s18, %s41_s18 }
   0x8   :  { %p819_p0 = scmp.ne.s32.totalorder %s41_s18, %s818_s21  ;;  %p824_p2 = scmp.lt.s32.totalorder %s818_s21, %s818_s21 }
   0xa   :  { %p825_p3 = por %p824_p2, %p823_p1 }
   0xc   :  { %p826_p4 = pnand %p825_p3, %p819_p0 }
   0xe   :  { %829 = shalt.err (!%p826_p4)
}
   0xf   :  { %s984_s22 = smov 128   ;;  %s985_s23 = smov 8  }
  0x10   :  { %46 = dma.hbm_to_vmem [thread:$0]  %s1110_s1, 256, %s41_s18, [#allocation6], %s984_s22, %s984_s22, %s985_s23  }
  0x11   :  { %s838_s26 = scalar_lea.vmem %s67_s20, 4096  ;;  %p843_p6 = scmp.lt.s32.totalorder %s67_s20, %s67_s20 }
  0x12   :  { %p839_p5 = scmp.ne.s32.totalorder %s67_s20, %s838_s26  ;;  %p844_p7 = scmp.lt.s32.totalorder %s838_s26, %s838_s26 }
  0x14   :  { %p845_p8 = por %p844_p7, %p843_p6 }
  0x16   :  { %p846_p9 = pnand %p845_p8, %p839_p5 }
  0x18   :  { %849 = shalt.err (!%p846_p9)
}
  0x19   :  { %s986_s27 = smov 256   ;;  %s987_s28 = smov 16  }
  0x1a   :  { %72 = dma.hbm_to_vmem [thread:$0]  %s1113_s4, 4096, %s67_s20, [#allocation9], %s986_s27, %s986_s27, %s987_s28  }
  0x1b   :  { %s988_s12 = smov [#allocation2]   ;;  %s989_s14 = smov [#allocation7]  }
  0x1c   :  { %s28_s13 = sshll.u32 %s988_s12, 4  ;;  %s52_s15 = sshll.u32 %s989_s14, 4  ;;  %s29_s13 = int_to_ptr.vmem [resolvable:$true] %s28_s13  ;;  %s53_s15 = int_to_ptr.vmem [resolvable:$true] %s52_s15 }
  0x1d   :  { %s858_s1 = scalar_lea.vmem %s29_s13, 256  ;;  %p863_p11 = scmp.lt.s32.totalorder %s29_s13, %s29_s13 }
  0x1e   :  { %p859_p10 = scmp.ne.s32.totalorder %s29_s13, %s858_s1  ;;  %p864_p12 = scmp.lt.s32.totalorder %s858_s1, %s858_s1 }
  0x20   :  { %p865_p13 = por %p864_p12, %p863_p11 }
  0x22   :  { %p866_p0 = pnand %p865_p13, %p859_p10 }
  0x24   :  { %869 = shalt.err (!%p866_p0)
}
  0x25   :  { %34 = dma.hbm_to_vmem [thread:$0]  %s1109_s0, 256, %s29_s13, [#allocation3], %s984_s22, %s984_s22, %s985_s23  }
  0x26   :  { %s878_s4 = scalar_lea.vmem %s53_s15, 2048  ;;  %p883_p2 = scmp.lt.s32.totalorder %s53_s15, %s53_s15 }
  0x27   :  { %p879_p1 = scmp.ne.s32.totalorder %s53_s15, %s878_s4  ;;  %p884_p3 = scmp.lt.s32.totalorder %s878_s4, %s878_s4 }
  0x29   :  { %p885_p4 = por %p884_p3, %p883_p2 }
  0x2b   :  { %p886_p5 = pnand %p885_p4, %p879_p1 }
  0x2d   :  { %889 = shalt.err (!%p886_p5)
}
  0x2e   :  { %58 = dma.hbm_to_vmem [thread:$0]  %s1111_s2, 2048, %s53_s15, [#allocation6], %s984_s22, %s984_s22, %s985_s23  }
  0x2f   :  { %s990_s20 = smov [#allocation10]   ;;  %s991_s24 = smov [#allocation11]  }
  0x30   :  { %s80_s21 = sshll.u32 %s990_s20, 4  ;;  %s94_s25 = sshll.u32 %s991_s24, 4  ;;  %s81_s21 = int_to_ptr.vmem [resolvable:$true] %s80_s21  ;;  %s95_s25 = int_to_ptr.vmem [resolvable:$true] %s94_s25 }
  0x31   :  { %s898_s0 = scalar_lea.vmem %s81_s21, 2048  ;;  %p903_p7 = scmp.lt.s32.totalorder %s81_s21, %s81_s21 }
  0x32   :  { %p899_p6 = scmp.ne.s32.totalorder %s81_s21, %s898_s0  ;;  %p904_p8 = scmp.lt.s32.totalorder %s898_s0, %s898_s0 }
  0x34   :  { %p905_p9 = por %p904_p8, %p903_p7 }
  0x36   :  { %p906_p10 = pnand %p905_p9, %p899_p6 }
  0x38   :  { %909 = shalt.err (!%p906_p10)
}
  0x39   :  { %86 = dma.hbm_to_vmem [thread:$0]  %s1115_s6, 2048, %s81_s21, [#allocation9], %s984_s22, %s984_s22, %s985_s23  }
  0x3a   :  { %s918_s2 = scalar_lea.vmem %s95_s25, 2048  ;;  %p923_p12 = scmp.lt.s32.totalorder %s95_s25, %s95_s25 }
  0x3b   :  { %p919_p11 = scmp.ne.s32.totalorder %s95_s25, %s918_s2  ;;  %p924_p13 = scmp.lt.s32.totalorder %s918_s2, %s918_s2 }
  0x3d   :  { %p925_p0 = por %p924_p13, %p923_p12 }
  0x3f   :  { %p926_p1 = pnand %p925_p0, %p919_p11 }
  0x41   :  { %929 = shalt.err (!%p926_p1)
}
  0x42   :  { %100 = dma.hbm_to_vmem [thread:$0]  %s1117_s8, 2048, %s95_s25, [#allocation12], %s984_s22, %s984_s22, %s985_s23  }
  0x43   :  { %970 = dma.done.wait [#allocation3], 256  }
  0x44   :  { %971 = vsyncadd [#allocation3], 4294967040 }
  0x45   :  { %972 = dma.done.wait [#allocation6], 2304  }
  0x46   :  { %973 = vsyncadd [#allocation6], 4294964992 }
  0x47   :  { %974 = dma.done.wait [#allocation9], 6144  }
  0x48   :  { %975 = vsyncadd [#allocation9], 4294961152 }
  0x49   :  { %976 = dma.done.wait [#allocation12], 2048  }
  0x4a   :  { %977 = vsyncadd [#allocation12], 4294965248  ;;  %v144_v0 = vld [vmem:[#allocation7 + $0x78] sm:$0xff]  ;;  %v143_v1 = vld [vmem:[#allocation7 + $0x70] sm:$0xff]  ;;  %v992_v50 = vmov 0.0   ;;  %s993_s14 = smov [#allocation14]  }
  0x4b   :  { %686 = vmatprep.subr.mxu0 %v144_v0  ;;  %v142_v2 = vld [vmem:[#allocation7 + $0x68] sm:$0xff]  ;;  %v141_v3 = vld [vmem:[#allocation7 + $0x60] sm:$0xff]  ;;  %v140_v4 = vld [vmem:[#allocation7 + $0x58] sm:$0xff]  ;;  %335 = vmatprep.mubr.f32.mxu1 %v992_v50  ;;  %s611_s15 = sshll.u32 %s993_s14, 4  ;;  %s612_s15 = int_to_ptr.vmem [resolvable:$true] %s611_s15 }
  0x4c   :  { %687 = vmatpush3.msra.mxu0 %v144_v0  ;;  %v121_v5 = vld [vmem:[#allocation2] sm:$0xff]  ;;  %v259_v6 = vld [vmem:[#allocation8 + $0xf8] sm:$0xff]  ;;  %v258_v7 = vld [vmem:[#allocation8 + $0xf0] sm:$0xff]  ;;  %s930_s1 = scalar_lea.vmem %s612_s15, 128  ;;  %p935_p3 = scmp.lt.s32.totalorder %s612_s15, %s612_s15 }
  0x4d   :  { %688 = vmatprep.subr.mxu0 %v143_v1  ;;  %718 = vmatprep.mubr.f32.mxu0 %v121_v5  ;;  %v257_v8 = vld [vmem:[#allocation8 + $0xe8] sm:$0xff]  ;;  %v256_v9 = vld [vmem:[#allocation8 + $0xe0] sm:$0xff]  ;;  %v139_v10 = vld [vmem:[#allocation7 + $0x50] sm:$0xff]  ;;  %p931_p2 = scmp.ne.s32.totalorder %s612_s15, %s930_s1  ;;  %p936_p4 = scmp.lt.s32.totalorder %s930_s1, %s930_s1 }
  0x4e   :  { %689 = vmatpush3.msra.mxu0 %v143_v1  ;;  %271 = vmatprep.subr.mxu1 %v259_v6  ;;  %v255_v11 = vld [vmem:[#allocation8 + $0xd8] sm:$0xff]  ;;  %v254_v12 = vld [vmem:[#allocation8 + $0xd0] sm:$0xff]  ;;  %v138_v13 = vld [vmem:[#allocation7 + $0x48] sm:$0xff] }
  0x4f   :  { %690 = vmatprep.subr.mxu0 %v142_v2  ;;  %272 = vmatpush1.msra.mxu1 %v258_v7  ;;  %v253_v14 = vld [vmem:[#allocation8 + $0xc8] sm:$0xff]  ;;  %v252_v15 = vld [vmem:[#allocation8 + $0xc0] sm:$0xff]  ;;  %v251_v17 = vld [vmem:[#allocation8 + $0xb8] sm:$0xff]  ;;  %p937_p5 = por %p936_p4, %p935_p3 }
  0x50   :  { %691 = vmatpush3.msra.mxu0 %v142_v2  ;;  %273 = vmatprep.subr.mxu1 %v257_v8  ;;  %v137_v16 = vld [vmem:[#allocation7 + $0x40] sm:$0xff]  ;;  %v250_v18 = vld [vmem:[#allocation8 + $0xb0] sm:$0xff]  ;;  %v136_v19 = vld [vmem:[#allocation7 + $0x38] sm:$0xff] }
  0x51   :  { %692 = vmatprep.subr.mxu0 %v141_v3  ;;  %274 = vmatpush1.msra.mxu1 %v256_v9  ;;  %v249_v20 = vld [vmem:[#allocation8 + $0xa8] sm:$0xff]  ;;  %v248_v21 = vld [vmem:[#allocation8 + $0xa0] sm:$0xff]  ;;  %v135_v22 = vld [vmem:[#allocation7 + $0x30] sm:$0xff]  ;;  %p938_p6 = pnand %p937_p5, %p931_p2 }
  0x52   :  { %693 = vmatpush3.msra.mxu0 %v141_v3  ;;  %275 = vmatprep.subr.mxu1 %v255_v11  ;;  %v247_v23 = vld [vmem:[#allocation8 + $0x98] sm:$0xff]  ;;  %v246_v24 = vld [vmem:[#allocation8 + $0x90] sm:$0xff]  ;;  %v134_v25 = vld [vmem:[#allocation7 + $0x28] sm:$0xff] }
  0x53   :  { %694 = vmatprep.subr.mxu0 %v140_v4  ;;  %276 = vmatpush1.msra.mxu1 %v254_v12  ;;  %v245_v26 = vld [vmem:[#allocation8 + $0x88] sm:$0xff]  ;;  %v244_v27 = vld [vmem:[#allocation8 + $0x80] sm:$0xff]  ;;  %v243_v29 = vld [vmem:[#allocation8 + $0x78] sm:$0xff] }
  0x54   :  { %695 = vmatpush3.msra.mxu0 %v140_v4  ;;  %277 = vmatprep.subr.mxu1 %v253_v14  ;;  %v133_v28 = vld [vmem:[#allocation7 + $0x20] sm:$0xff]  ;;  %v242_v30 = vld [vmem:[#allocation8 + $0x70] sm:$0xff]  ;;  %v132_v31 = vld [vmem:[#allocation7 + $0x18] sm:$0xff] }
  0x55   :  { %696 = vmatprep.subr.mxu0 %v139_v10  ;;  %278 = vmatpush1.msra.mxu1 %v252_v15  ;;  %v241_v32 = vld [vmem:[#allocation8 + $0x68] sm:$0xff]  ;;  %v240_v33 = vld [vmem:[#allocation8 + $0x60] sm:$0xff]  ;;  %v131_v34 = vld [vmem:[#allocation7 + $0x10] sm:$0xff] }
  0x56   :  { %697 = vmatpush3.msra.mxu0 %v139_v10  ;;  %279 = vmatprep.subr.mxu1 %v251_v17  ;;  %v239_v35 = vld [vmem:[#allocation8 + $0x58] sm:$0xff]  ;;  %v238_v36 = vld [vmem:[#allocation8 + $0x50] sm:$0xff]  ;;  %v130_v37 = vld [vmem:[#allocation7 + $0x8] sm:$0xff]  ;;  %v261_v10 = vlaneseq }
  0x57   :  { %698 = vmatprep.subr.mxu0 %v138_v13  ;;  %280 = vmatpush1.msra.mxu1 %v250_v18  ;;  %v237_v38 = vld [vmem:[#allocation8 + $0x48] sm:$0xff]  ;;  %v236_v39 = vld [vmem:[#allocation8 + $0x40] sm:$0xff]  ;;  %v235_v41 = vld [vmem:[#allocation8 + $0x38] sm:$0xff] }
  0x58   :  { %699 = vmatpush3.msra.mxu0 %v138_v13  ;;  %281 = vmatprep.subr.mxu1 %v249_v20  ;;  %v129_v40 = vld [vmem:[#allocation7] sm:$0xff]  ;;  %v122_v42 = vld [vmem:[#allocation2 + $0x8] sm:$0xff]  ;;  %v234_v43 = vld [vmem:[#allocation8 + $0x30] sm:$0xff]  ;;  %v262_v11 = vshrl.u32 %v261_v10, 7 }
  0x59   :  { %700 = vmatprep.subr.mxu0 %v137_v16  ;;  %282 = vmatpush1.msra.mxu1 %v248_v21  ;;  %v233_v44 = vld [vmem:[#allocation8 + $0x28] sm:$0xff]  ;;  %v232_v45 = vld [vmem:[#allocation8 + $0x20] sm:$0xff]  ;;  %v231_v46 = vld [vmem:[#allocation8 + $0x18] sm:$0xff] }
  0x5a   :  { %701 = vmatpush3.msra.mxu0 %v137_v16  ;;  %283 = vmatprep.subr.mxu1 %v247_v23  ;;  %v230_v47 = vld [vmem:[#allocation8 + $0x10] sm:$0xff]  ;;  %v229_v48 = vld [vmem:[#allocation8 + $0x8] sm:$0xff]  ;;  %v228_v49 = vld [vmem:[#allocation8] sm:$0xff]  ;;  %v267_v12 = vsub.s32 1, %v262_v11  ;;  %v263_v14 = vsub.s32 0, %v262_v11 }
  0x5b   :  { %702 = vmatprep.subr.mxu0 %v136_v19  ;;  %284 = vmatpush1.msra.mxu1 %v246_v24  ;;  %v410_v51 = vld [vmem:[#allocation10 + $0x78] sm:$0xff]  ;;  %v409_v52 = vld [vmem:[#allocation10 + $0x70] sm:$0xff]  ;;  %v408_v53 = vld [vmem:[#allocation10 + $0x68] sm:$0xff] }
  0x5c   :  { %703 = vmatpush3.msra.mxu0 %v136_v19  ;;  %285 = vmatprep.subr.mxu1 %v245_v26  ;;  %v407_v54 = vld [vmem:[#allocation10 + $0x60] sm:$0xff]  ;;  %v406_v55 = vld [vmem:[#allocation10 + $0x58] sm:$0xff]  ;;  %v405_v56 = vld [vmem:[#allocation10 + $0x50] sm:$0xff] }
  0x5d   :  { %704 = vmatprep.subr.mxu0 %v135_v22  ;;  %286 = vmatpush1.msra.mxu1 %v244_v27  ;;  %v404_v57 = vld [vmem:[#allocation10 + $0x48] sm:$0xff]  ;;  %v403_v58 = vld [vmem:[#allocation10 + $0x40] sm:$0xff]  ;;  %v402_v59 = vld [vmem:[#allocation10 + $0x38] sm:$0xff] }
  0x5e   :  { %705 = vmatpush3.msra.mxu0 %v135_v22  ;;  %287 = vmatprep.subr.mxu1 %v243_v29  ;;  %v401_v60 = vld [vmem:[#allocation10 + $0x30] sm:$0xff]  ;;  %v627_v62 = vld [vmem:[%s1112_s3] ss:$0 sm:$0xff]  ;;  %v400_v4 = vld [vmem:[#allocation10 + $0x28] sm:$0xff] }
  0x5f   :  { %706 = vmatprep.subr.mxu0 %v134_v25  ;;  %288 = vmatpush1.msra.mxu1 %v242_v30  ;;  %v399_v5 = vld [vmem:[#allocation10 + $0x20] sm:$0xff]  ;;  %v398_v6 = vld [vmem:[#allocation10 + $0x18] sm:$0xff]  ;;  %v397_v7 = vld [vmem:[#allocation10 + $0x10] sm:$0xff] }
  0x60   :  { %707 = vmatpush3.msra.mxu0 %v134_v25  ;;  %289 = vmatprep.subr.mxu1 %v241_v32  ;;  %v396_v8 = vld [vmem:[#allocation10 + $0x8] sm:$0xff]  ;;  %v395_v9 = vld [vmem:[#allocation10] sm:$0xff]  ;;  %v123_v18 = vld [vmem:[#allocation5] sm:$0xff] }
  0x61   :  { %708 = vmatprep.subr.mxu0 %v133_v28  ;;  %290 = vmatpush1.msra.mxu1 %v240_v33  ;;  %v126_v13 = vld [vmem:[%s1114_s5] sm:$0x3]  ;;  %v124_v25 = vld [vmem:[#allocation5 + $0x8] sm:$0xff] }
  0x62   :  { %709 = vmatpush3.msra.mxu0 %v133_v28  ;;  %291 = vmatprep.subr.mxu1 %v239_v35  ;;  %v268_v15 = vrot.slane %v126_v13, %v267_v12  ;;  %v264_v17 = vrot.slane %v126_v13, %v263_v14 }
  0x63   :  { %710 = vmatprep.subr.mxu0 %v132_v31  ;;  %292 = vmatpush1.msra.mxu1 %v238_v36 }
  0x64   :  { %711 = vmatpush3.msra.mxu0 %v132_v31  ;;  %293 = vmatprep.subr.mxu1 %v237_v38 }
  0x65   :  { %712 = vmatprep.subr.mxu0 %v131_v34  ;;  %294 = vmatpush1.msra.mxu1 %v236_v39 }
  0x66   :  { %713 = vmatpush3.msra.mxu0 %v131_v34  ;;  %295 = vmatprep.subr.mxu1 %v235_v41 }
  0x67   :  { %714 = vmatprep.subr.mxu0 %v130_v37  ;;  %296 = vmatpush1.msra.mxu1 %v234_v43 }
  0x68   :  { %715 = vmatpush3.msra.mxu0 %v130_v37  ;;  %297 = vmatprep.subr.mxu1 %v233_v44 }
  0x69   :  { %716 = vmatprep.subr.mxu0 %v129_v40  ;;  %298 = vmatpush1.msra.mxu1 %v232_v45 }
  0x6a   :  { %717 = vmatpush3.msra.mxu0 %v129_v40  ;;  %299 = vmatprep.subr.mxu1 %v231_v46  ;;  %v360_v40 = vand.u32 127, %v261_v10 }
  0x6b   :  { %719 = vmatmul.mubr.f32.vlgmr.msra.gmra.mxu0 %v122_v42  ;;  %300 = vmatpush1.msra.mxu1 %v230_v47 }
  0x6c   :  { %301 = vmatprep.subr.mxu1 %v229_v48  ;;  %721 = vmatprep.subr.mxu0 %v410_v51  ;;  %vm363_vm0 = vcmp.lt.s32.totalorder %v360_v40, 8 }
  0x6d   :  { %302 = vmatpush1.msra.mxu1 %v228_v49  ;;  %722 = vmatpush3.msra.mxu0 %v410_v51  ;;  %v509_v49 = vld [vmem:[#allocation11 + $0x78] sm:$0xff]  ;;  %v507_v51 = vld [vmem:[#allocation11 + $0x68] sm:$0xff] }
  0x6e   :  { %723 = vmatprep.subr.mxu0 %v409_v52  ;;  %756 = vmatprep.subr.mxu1 %v509_v49 }
  0x6f   :  { %724 = vmatpush3.msra.mxu0 %v409_v52  ;;  %v506_v52 = vld [vmem:[#allocation11 + $0x60] sm:$0xff] }
  0x70   :  { %725 = vmatprep.subr.mxu0 %v408_v53 }
  0x71   :  { %726 = vmatpush3.msra.mxu0 %v408_v53  ;;  %v505_v53 = vld [vmem:[#allocation11 + $0x58] sm:$0xff] }
  0x72   :  { %727 = vmatprep.subr.mxu0 %v407_v54 }
  0x73   :  { %728 = vmatpush3.msra.mxu0 %v407_v54  ;;  %v504_v54 = vld [vmem:[#allocation11 + $0x50] sm:$0xff] }
  0x74   :  { %729 = vmatprep.subr.mxu0 %v406_v55 }
  0x75   :  { %730 = vmatpush3.msra.mxu0 %v406_v55  ;;  %v503_v55 = vld [vmem:[#allocation11 + $0x48] sm:$0xff] }
  0x76   :  { %731 = vmatprep.subr.mxu0 %v405_v56 }
  0x77   :  { %732 = vmatpush3.msra.mxu0 %v405_v56  ;;  %v502_v56 = vld [vmem:[#allocation11 + $0x40] sm:$0xff] }
  0x78   :  { %733 = vmatprep.subr.mxu0 %v404_v57 }
  0x79   :  { %734 = vmatpush3.msra.mxu0 %v404_v57  ;;  %v501_v57 = vld [vmem:[#allocation11 + $0x38] sm:$0xff] }
  0x7a   :  { %735 = vmatprep.subr.mxu0 %v403_v58 }
  0x7b   :  { %736 = vmatpush3.msra.mxu0 %v403_v58  ;;  %v500_v58 = vld [vmem:[#allocation11 + $0x30] sm:$0xff] }
  0x7c   :  { %737 = vmatprep.subr.mxu0 %v402_v59 }
  0x7d   :  { %738 = vmatpush3.msra.mxu0 %v402_v59  ;;  %v499_v59 = vld [vmem:[#allocation11 + $0x28] sm:$0xff] }
  0x7e   :  { %739 = vmatprep.subr.mxu0 %v401_v60 }
  0x7f   :  { %740 = vmatpush3.msra.mxu0 %v401_v60  ;;  %v498_v60 = vld [vmem:[#allocation11 + $0x20] sm:$0xff] }
  0x80   :  { %741 = vmatprep.subr.mxu0 %v400_v4 }
  0x81   :  { %742 = vmatpush3.msra.mxu0 %v400_v4 }
  0x82   :  { %743 = vmatprep.subr.mxu0 %v399_v5 }
  0x83   :  { %744 = vmatpush3.msra.mxu0 %v399_v5 }
  0x84   :  { %745 = vmatprep.subr.mxu0 %v398_v6 }
  0x85   :  { %746 = vmatpush3.msra.mxu0 %v398_v6 }
  0x86   :  { %747 = vmatprep.subr.mxu0 %v397_v7 }
  0x87   :  { %748 = vmatpush3.msra.mxu0 %v397_v7 }
  0x88   :  { %749 = vmatprep.subr.mxu0 %v396_v8 }
  0x89   :  { %750 = vmatpush3.msra.mxu0 %v396_v8  ;;  %v630_v8 = vld [vmem:[%s1116_s7] ss:$0 sm:$0xff] }
  0x8a   :  { %751 = vmatprep.subr.mxu0 %v395_v9 }
  0x8b   :  { %752 = vmatpush3.msra.mxu0 %v395_v9 }
 0x12b   :  { %v720_v61 = vpop.f32.mrf.mxu0 }
 0x12c   :  { %v223_v1 = vadd.f32 %v720_v61, %v627_v62  ;;  %v497_v61 = vld [vmem:[#allocation11 + $0x18] sm:$0xff] }
 0x12d   :  { %v217_v63 = vpop.f32.mrf.mxu0 }
 0x12e   :  { %v218_v0 = vadd.f32 %v627_v62, %v217_v63  ;;  %v227_v3 = vmax.f32 %v223_v1, 0.0  ;;  %v496_v62 = vld [vmem:[#allocation11 + $0x10] sm:$0xff]  ;;  %v495_v63 = vld [vmem:[#allocation11 + $0x8] sm:$0xff] }
 0x130   :  { %v226_v2 = vmax.f32 %v218_v0, 0.0  ;;  %v494_v0 = vld [vmem:[#allocation11] sm:$0xff] }
 0x132   :  { %336 = vmatmul.mubr.f32.vlgmr.msra.gmra.mxu1 %v226_v2 }
 0x133   :  { %341 = vmatprep.mubr.f32.mxu1 %v992_v50  ;;  %v508_v50 = vld [vmem:[#allocation11 + $0x70] sm:$0xff]  ;;  %757 = vmatpush3.msra.mxu1 %v509_v49 }
 0x134   :  { %758 = vmatprep.subr.mxu1 %v508_v50 }
 0x135   :  { %759 = vmatpush3.msra.mxu1 %v508_v50 }
 0x136   :  { %342 = vmatmul.mubr.f32.gmra.mxu1 %v227_v3  ;;  %760 = vmatprep.subr.mxu1 %v507_v51 }
 0x137   :  { %761 = vmatpush3.msra.mxu1 %v507_v51 }
 0x138   :  { %762 = vmatprep.subr.mxu1 %v506_v52 }
 0x139   :  { %763 = vmatpush3.msra.mxu1 %v506_v52 }
 0x13a   :  { %764 = vmatprep.subr.mxu1 %v505_v53 }
 0x13b   :  { %765 = vmatpush3.msra.mxu1 %v505_v53 }
 0x13c   :  { %766 = vmatprep.subr.mxu1 %v504_v54 }
 0x13d   :  { %767 = vmatpush3.msra.mxu1 %v504_v54 }
 0x13e   :  { %768 = vmatprep.subr.mxu1 %v503_v55 }
 0x13f   :  { %769 = vmatpush3.msra.mxu1 %v503_v55 }
 0x140   :  { %770 = vmatprep.subr.mxu1 %v502_v56 }
 0x141   :  { %771 = vmatpush3.msra.mxu1 %v502_v56 }
 0x142   :  { %772 = vmatprep.subr.mxu1 %v501_v57 }
 0x143   :  { %773 = vmatpush3.msra.mxu1 %v501_v57 }
 0x144   :  { %774 = vmatprep.subr.mxu1 %v500_v58 }
 0x145   :  { %775 = vmatpush3.msra.mxu1 %v500_v58 }
 0x146   :  { %776 = vmatprep.subr.mxu1 %v499_v59 }
 0x147   :  { %777 = vmatpush3.msra.mxu1 %v499_v59 }
 0x148   :  { %778 = vmatprep.subr.mxu1 %v498_v60 }
 0x149   :  { %779 = vmatpush3.msra.mxu1 %v498_v60 }
 0x14a   :  { %780 = vmatprep.subr.mxu1 %v497_v61 }
 0x14b   :  { %781 = vmatpush3.msra.mxu1 %v497_v61 }
 0x14c   :  { %782 = vmatprep.subr.mxu1 %v496_v62 }
 0x14d   :  { %783 = vmatpush3.msra.mxu1 %v496_v62 }
 0x14e   :  { %784 = vmatprep.subr.mxu1 %v495_v63 }
 0x14f   :  { %785 = vmatpush3.msra.mxu1 %v495_v63 }
 0x150   :  { %786 = vmatprep.subr.mxu1 %v494_v0 }
 0x151   :  { %787 = vmatpush3.msra.mxu1 %v494_v0 }
 0x1f2   :  { %v337_v16 = vpop.f32.mrf.mxu1 }
 0x1f3   :  { %v338_v24 = vadd.f32 %v337_v16, %v264_v17 }
 0x1f4   :  { %v339_v19 = vpop.f32.mrf.mxu1 }
 0x1f5   :  { %v340_v20 = vadd.f32 %v339_v19, %v268_v15  ;;  %v368_v33 = vmul.f32 %v338_v24, %v338_v24 }
 0x1f6   :  { %v343_v21 = vpop.f32.mrf.mxu1 }
 0x1f7   :  { %v348_v22 = vmul.f32 %v340_v20, %v123_v18  ;;  %v366_v23 = vmul.f32 %v340_v20, %v340_v20  ;;  %v344_v29 = vadd.f32 %v343_v21, %v264_v17 }
 0x1f8   :  { %v345_v26 = vpop.f32.mrf.mxu1 }
 0x1f9   :  { %806 = vlog2.f32 %v366_v23  ;;  %v346_v27 = vadd.f32 %v345_v26, %v268_v15  ;;  %v350_v28 = vadd.f32 %v348_v22, %v338_v24  ;;  %v370_v35 = vadd.f32 %v368_v33, %v366_v23 }
 0x1fa   :  { %v369_v37 = vmul.f32 %v344_v29, %v344_v29 }
 0x1fb   :  { %v349_v30 = vmul.f32 %v346_v27, %v124_v25  ;;  %v367_v31 = vmul.f32 %v346_v27, %v346_v27  ;;  %753 = vmatprep.mubr.f32.mxu0 %v350_v28 }
 0x1fd   :  { %v351_v32 = vadd.f32 %v349_v30, %v344_v29  ;;  %808 = vlog2.f32 %v367_v31  ;;  %v371_v41 = vadd.f32 %v369_v37, %v367_v31 }
 0x1ff   :  { %754 = vmatmul.mubr.f32.vlgmr.msra.gmra.mxu0 %v351_v32 }
 0x206   :  { %v807_v34 = vpop.eup %806 }
 0x207   :  { %v373_v36 = vmul.f32 0.6931472, %v807_v34 }
 0x209   :  { %v376_v38 = vsub.f32 %v370_v35, %v373_v36 }
 0x20a   :  { %v809_v39 = vpop.eup %808 }
 0x20b   :  { %v375_v42 = vmul.f32 0.6931472, %v809_v39  ;;  %v628_v44 = vadd.f32 -1.0, %v376_v38 }
 0x20d   :  { %v377_v43 = vsub.f32 %v371_v41, %v375_v42  ;;  %v380_v46 = vsel %vm363_vm0, %v628_v44, 0.0 }
 0x20f   :  { %v629_v45 = vadd.f32 -1.0, %v377_v43 }
 0x211   :  { %v381_v47 = vsel %vm363_vm0, %v629_v45, 0.0 }
 0x212   :  { %v382_v48 = vadd.f32 %v381_v47, %v380_v46 }
 0x214   :  { %383 = vadd.xlane.f32.xlu0 %v382_v48 }
 0x29d   :  { %v384_v1 = vpop.xlane.xlu0 %383 }
 0x29e   :  { %v385_v2 = vrot.slane %v384_v1, 4 }
 0x2a0   :  { %v386_v3 = vadd.f32 %v385_v2, %v384_v1 }
 0x2a2   :  { %v387_v4 = vrot.slane %v386_v3, 2 }
 0x2a4   :  { %v388_v5 = vadd.f32 %v387_v4, %v386_v3 }
 0x2a6   :  { %v389_v6 = vrot.slane %v388_v5, 1 }
 0x2a8   :  { %v390_v7 = vadd.f32 %v389_v6, %v388_v5 }
 0x2aa   :  { %791 = vpush %v390_v7 }
 0x2bf   :  { %v755_v9 = vpop.f32.mrf.mxu0 }
 0x2c0   :  { %v489_v10 = vadd.f32 %v755_v9, %v630_v8 }
 0x2c1   :  { %v483_v11 = vpop.f32.mrf.mxu0 }
 0x2c2   :  { %v484_v12 = vadd.f32 %v630_v8, %v483_v11  ;;  %v493_v14 = vmax.f32 %v489_v10, 0.0 }
 0x2c4   :  { %v492_v13 = vmax.f32 %v484_v12, 0.0 }
 0x2c6   :  { %788 = vmatprep.mubr.f32.mxu1 %v492_v13 }
 0x2c7   :  { %789 = vmatmul.mubr.f32.vlgmr.msra.gmra.mxu1 %v493_v14 }
 0x2db   :  { %s792_s13 = spop %791 }
 0x2dc   :  { %v392_v15 = vstv %s792_s13 }
 0x2dd   :  { %v393_v16 = vmul.f32 0.5, %v392_v15 }
 0x2df   :  { %394 = vst [vmem:[#allocation14] sm:$0xff] %v393_v16 }
 0x2e0   :  { %941 = shalt.err (!%p938_p6)
}
 0x2e1   :  { %614 = dma.vmem_to_hbm [thread:$0]  %s612_s15, 128, %s1120_s11, [#allocation15]   ;;  %v631_v17 = vld [vmem:[%s1118_s9] ss:$0 sm:$0xff] }
 0x2e2   :  { %s994_s18 = smov [#allocation13]  }
 0x2e3   :  { %s598_s19 = sshll.u32 %s994_s18, 4  ;;  %s599_s19 = int_to_ptr.vmem [resolvable:$true] %s598_s19 }
 0x2e4   :  { %s950_s20 = scalar_lea.vmem %s599_s19, 256  ;;  %p955_p8 = scmp.lt.s32.totalorder %s599_s19, %s599_s19 }
 0x2e5   :  { %p951_p7 = scmp.ne.s32.totalorder %s599_s19, %s950_s20  ;;  %p956_p9 = scmp.lt.s32.totalorder %s950_s20, %s950_s20 }
 0x2e7   :  { %p957_p10 = por %p956_p9, %p955_p8 }
 0x2e9   :  { %p958_p11 = pnand %p957_p10, %p951_p7 }
 0x387   :  { %v790_v18 = vpop.f32.mrf.mxu1 }
 0x388   :  { %v588_v19 = vadd.f32 %v790_v18, %v631_v17 }
 0x389   :  { %v582_v20 = vpop.f32.mrf.mxu1 }
 0x38a   :  { %592 = vst [vmem:[#allocation13 + $0x8] sm:$0xff] %v588_v19  ;;  %v583_v21 = vadd.f32 %v631_v17, %v582_v20 }
 0x38c   :  { %591 = vst [vmem:[#allocation13] sm:$0xff] %v583_v21 }
 0x38d   :  { %961 = shalt.err (!%p958_p11)
}
 0x38e   :  { %604 = dma.vmem_to_hbm [thread:$0]  %s599_s19, 256, %s1119_s10, [#allocation4], %s984_s22, %s984_s22, %s985_s23  }
 0x38f   :  { %978 = dma.done.wait [#allocation4], 256  }
 0x390   :  { %979 = vsyncadd [#allocation4], 4294967040 }
 0x391   :  { %980 = dma.done.wait [#allocation15], 128  }
 0x392   :  { %981 = vsyncadd [#allocation15], 4294967168 }
 0x393   :  { %621 = vsyncpa [#allocation3], 1 }
 0x394   :  { %622 = vsyncpa [#allocation6], 1 }
 0x395   :  { %623 = vsyncpa [#allocation9], 1 }
 0x396   :  { %624 = vsyncpa [#allocation12], 1 }
 0x397   :  { %625 = vsyncpa [#allocation4], 1 }
 0x398   :  { %626 = vsyncpa [#allocation15], 1 }

</bundles_post_ra>
